<compile_context>
chip_gen: v7x
topology: tpu7x:2x2x1
jax: 0.10.0
libtpu: 0.0.40
codegen_flags: <defaults>
</compile_context>

<pallas_src>
import functools

import jax
import jax.numpy as jnp
from jax import lax
from jax.experimental import pallas as pl
from jax.experimental.pallas import tpu as pltpu


def _adain_kernel(x_ref, w_ref, ws_ref, bs_ref, wb_ref, bb_ref, o_ref, *,
                  ws_scale, eps):
    """One (batch b, channel-tile j) grid step.

    x_ref  : (1, tc, HW)  feature-map tile for batch b
    w_ref  : (B, w_dim)   full style-vector matrix (VMEM-resident across the grid)
    ws_ref : (tc, w_dim)  style_scale WSLinear weight rows for this channel tile
    bs_ref : (tc, 1)      style_scale bias slice
    wb_ref : (tc, w_dim)  style_bias  WSLinear weight rows
    bb_ref : (tc, 1)      style_bias  bias slice
    o_ref  : (1, tc, HW)
    """
    b = pl.program_id(0)
    wrow = w_ref[pl.ds(b, 1), :].astype(jnp.float32)            # (1, w_dim)

    # WSLinear heads for this tile: (w*s) @ W.T + b  ==  (W . w) * s + b
    # (scalar folded into the tiny epilogue; bias fused into the same pass).
    ss = jnp.sum(ws_ref[...].astype(jnp.float32) * wrow, axis=-1, keepdims=True)  # (tc, 1)
    sb = jnp.sum(wb_ref[...].astype(jnp.float32) * wrow, axis=-1, keepdims=True)  # (tc, 1)
    ss = ss * ws_scale + bs_ref[...].astype(jnp.float32)
    sb = sb * ws_scale + bb_ref[...].astype(jnp.float32)

    # InstanceNorm2d (no affine, biased variance, eps) over the HW lane axis.
    x = x_ref[0].astype(jnp.float32)                            # (tc, HW)
    mean = jnp.mean(x, axis=-1, keepdims=True)                  # (tc, 1)
    xc = x - mean
    var = jnp.mean(xc * xc, axis=-1, keepdims=True)             # biased, matches PyTorch
    xn = xc * lax.rsqrt(var + eps)

    o_ref[0] = (ss * xn + sb).astype(o_ref.dtype)


def _pick_channel_tile(C):
    # Largest "nice" sublane-aligned tile that divides C; fall back to the full
    # channel dim (always a legal block) for small / odd C.
    for cand in (256, 128, 64, 32, 16, 8):
        if C % cand == 0:
            return cand
    return C


def adain(x, w, scale_weight, scale_bias, bias_weight, bias_bias, *, eps=1e-5):
    """AdaIN forward.

    x            : (B, C, H, W)
    w            : (B, w_dim)
    scale_weight : (C, w_dim)  style_scale WSLinear weight (PyTorch layout, no transpose)
    scale_bias   : (C,)
    bias_weight  : (C, w_dim)  style_bias WSLinear weight
    bias_bias    : (C,)
    """
    B, C, H, W = x.shape
    Bw, w_dim = w.shape
    assert Bw == B
    assert scale_weight.shape == (C, w_dim) and bias_weight.shape == (C, w_dim)
    assert scale_bias.shape == (C,) and bias_bias.shape == (C,)

    ws_scale = (2.0 / w_dim) ** 0.5
    HW = H * W
    x3 = x.reshape(B, C, HW)              # lane-dense innermost dim (free reshape)
    bs2 = scale_bias.reshape(C, 1)
    bb2 = bias_bias.reshape(C, 1)

    tc = _pick_channel_tile(C)
    nc = C // tc

    # TODO(synk): for very large H*W feature maps, tile the spatial axis with a two-pass
    # (or Welford) statistics accumulation; this kernel holds one (tc, H*W) tile per step.

    kernel = functools.partial(_adain_kernel, ws_scale=ws_scale, eps=eps)

    out = pl.pallas_call(
        kernel,
        out_shape=jax.ShapeDtypeStruct((B, C, HW), x.dtype),
        grid_spec=pltpu.PrefetchScalarGridSpec(
            num_scalar_prefetch=0,
            grid=(B, nc),
            in_specs=[
                pl.BlockSpec((1, tc, HW), lambda b, j: (b, j, 0)),   # x tile
                pl.BlockSpec((B, w_dim), lambda b, j: (0, 0)),       # w (resident)
                pl.BlockSpec((tc, w_dim), lambda b, j: (j, 0)),      # Ws rows
                pl.BlockSpec((tc, 1), lambda b, j: (j, 0)),          # bs slice
                pl.BlockSpec((tc, w_dim), lambda b, j: (j, 0)),      # Wb rows
                pl.BlockSpec((tc, 1), lambda b, j: (j, 0)),          # bb slice
            ],
            out_specs=pl.BlockSpec((1, tc, HW), lambda b, j: (b, j, 0)),
        ),
        compiler_params=pltpu.CompilerParams(
            dimension_semantics=("parallel", "parallel")),
    )(x3, w, scale_weight, bs2, bias_weight, bb2)

    return out.reshape(B, C, H, W)


def adain_ref(x, w, scale_weight, scale_bias, bias_weight, bias_bias, eps=1e-5):
    s = (2.0 / w.shape[1]) ** 0.5
    style_scale = (w * s) @ scale_weight.T + scale_bias
    style_bias = (w * s) @ bias_weight.T + bias_bias
    mean = x.mean(axis=(2, 3), keepdims=True)
    var = ((x - mean) ** 2).mean(axis=(2, 3), keepdims=True)
    xn = (x - mean) / jnp.sqrt(var + eps)
    return style_scale[:, :, None, None] * xn + style_bias[:, :, None, None]


if __name__ == "__main__":
    key = jax.random.PRNGKey(0)
    k_x, k_w, k_ws, k_wb = jax.random.split(key, 4)

    B, C, H, W = 2, 4, 16, 16
    w_dim = 32

    x = jax.random.normal(k_x, (B, C, H, W), dtype=jnp.float32)
    w = jax.random.normal(k_w, (B, w_dim), dtype=jnp.float32)
    # WSLinear init: weight ~ N(0, 1), bias zero-initialized (per the module).
    scale_weight = jax.random.normal(k_ws, (C, w_dim), dtype=jnp.float32)
    bias_weight = jax.random.normal(k_wb, (C, w_dim), dtype=jnp.float32)
    scale_bias = jnp.zeros((C,), dtype=jnp.float32)
    bias_bias = jnp.zeros((C,), dtype=jnp.float32)

    out = adain(x, w, scale_weight, scale_bias, bias_weight, bias_bias)
    out = jax.block_until_ready(out)

    ref = adain_ref(x, w, scale_weight, scale_bias, bias_weight, bias_bias)
    assert out.shape == (B, C, H, W)
    assert jnp.allclose(out, ref, atol=1e-4, rtol=1e-4), "mismatch vs reference"

    print("KERNEL_OK")
</pallas_src>

<mosaic_0001>
module attributes {stable_mosaic.version = 11 : i64} {
  func.func @_adain_kernel(%arg0: i32, %arg1: i32, %arg2: memref<1x4x256xf32, #tpu.memory_space<vmem>>, %arg3: memref<2x32xf32, #tpu.memory_space<vmem>>, %arg4: memref<4x32xf32, #tpu.memory_space<vmem>>, %arg5: memref<4x1xf32, #tpu.memory_space<vmem>>, %arg6: memref<4x32xf32, #tpu.memory_space<vmem>>, %arg7: memref<4x1xf32, #tpu.memory_space<vmem>>, %arg8: memref<1x4x256xf32, #tpu.memory_space<vmem>>) attributes {dimension_semantics = [#tpu.dimension_semantics<parallel>, #tpu.dimension_semantics<parallel>], iteration_bounds = array<i64: 2, 1>, scalar_prefetch = 0 : i64, scratch_operands = 0 : i64, tpu.core_type = #tpu.core_type<tc>, window_params = [{transform_indices = @transform_0, window_bounds = array<i64: 1, 4, 256>}, {pipeline_mode = #tpu.pipeline_mode<synchronous>, transform_indices = @transform_1, window_bounds = array<i64: 2, 32>}, {transform_indices = @transform_2, window_bounds = array<i64: 4, 32>}, {transform_indices = @transform_3, window_bounds = array<i64: 4, 1>}, {transform_indices = @transform_4, window_bounds = array<i64: 4, 32>}, {transform_indices = @transform_5, window_bounds = array<i64: 4, 1>}, {transform_indices = @transform_6, window_bounds = array<i64: 1, 4, 256>}]} {
    %0 = arith.index_cast %arg0 : i32 to index
    %c0 = arith.constant 0 : index
    %1 = vector.load %arg3[%0, %c0] : memref<2x32xf32, #tpu.memory_space<vmem>>, vector<1x32xf32>
    %c0_0 = arith.constant 0 : index
    %c0_1 = arith.constant 0 : index
    %2 = vector.load %arg4[%c0_0, %c0_1] : memref<4x32xf32, #tpu.memory_space<vmem>>, vector<4x32xf32>
    %3 = vector.broadcast %1 : vector<1x32xf32> to vector<4x32xf32>
    %4 = arith.mulf %2, %3 : vector<4x32xf32>
    %cst = arith.constant dense<0.000000e+00> : vector<4xf32>
    %5 = vector.multi_reduction <add>, %4, %cst [1] : vector<4x32xf32> to vector<4xf32>
    %6 = vector.shape_cast %5 : vector<4xf32> to vector<4x1xf32>
    %c0_2 = arith.constant 0 : index
    %c0_3 = arith.constant 0 : index
    %7 = vector.load %arg6[%c0_2, %c0_3] : memref<4x32xf32, #tpu.memory_space<vmem>>, vector<4x32xf32>
    %8 = vector.broadcast %1 : vector<1x32xf32> to vector<4x32xf32>
    %9 = arith.mulf %7, %8 : vector<4x32xf32>
    %cst_4 = arith.constant dense<0.000000e+00> : vector<4xf32>
    %10 = vector.multi_reduction <add>, %9, %cst_4 [1] : vector<4x32xf32> to vector<4xf32>
    %11 = vector.shape_cast %10 : vector<4xf32> to vector<4x1xf32>
    %cst_5 = arith.constant 2.500000e-01 : f32
    %12 = vector.broadcast %cst_5 : f32 to vector<4x1xf32>
    %13 = arith.mulf %6, %12 : vector<4x1xf32>
    %c0_6 = arith.constant 0 : index
    %c0_7 = arith.constant 0 : index
    %14 = vector.load %arg5[%c0_6, %c0_7] : memref<4x1xf32, #tpu.memory_space<vmem>>, vector<4x1xf32>
    %15 = arith.addf %13, %14 : vector<4x1xf32>
    %cst_8 = arith.constant 2.500000e-01 : f32
    %16 = vector.broadcast %cst_8 : f32 to vector<4x1xf32>
    %17 = arith.mulf %11, %16 : vector<4x1xf32>
    %c0_9 = arith.constant 0 : index
    %c0_10 = arith.constant 0 : index
    %18 = vector.load %arg7[%c0_9, %c0_10] : memref<4x1xf32, #tpu.memory_space<vmem>>, vector<4x1xf32>
    %19 = arith.addf %17, %18 : vector<4x1xf32>
    %c0_11 = arith.constant 0 : index
    %c0_12 = arith.constant 0 : index
    %c0_13 = arith.constant 0 : index
    %20 = vector.load %arg2[%c0_11, %c0_12, %c0_13] : memref<1x4x256xf32, #tpu.memory_space<vmem>>, vector<1x4x256xf32>
    %21 = vector.shape_cast %20 : vector<1x4x256xf32> to vector<4x256xf32>
    %cst_14 = arith.constant dense<0.000000e+00> : vector<4xf32>
    %22 = vector.multi_reduction <add>, %21, %cst_14 [1] : vector<4x256xf32> to vector<4xf32>
    %23 = vector.shape_cast %22 : vector<4xf32> to vector<4x1xf32>
    %cst_15 = arith.constant 2.560000e+02 : f32
    %24 = vector.broadcast %cst_15 : f32 to vector<4x1xf32>
    %25 = arith.divf %23, %24 : vector<4x1xf32>
    %26 = vector.broadcast %25 : vector<4x1xf32> to vector<4x256xf32>
    %27 = arith.subf %21, %26 : vector<4x256xf32>
    %28 = arith.mulf %27, %27 : vector<4x256xf32>
    %cst_16 = arith.constant dense<0.000000e+00> : vector<4xf32>
    %29 = vector.multi_reduction <add>, %28, %cst_16 [1] : vector<4x256xf32> to vector<4xf32>
    %30 = vector.shape_cast %29 : vector<4xf32> to vector<4x1xf32>
    %cst_17 = arith.constant 2.560000e+02 : f32
    %31 = vector.broadcast %cst_17 : f32 to vector<4x1xf32>
    %32 = arith.divf %30, %31 : vector<4x1xf32>
    %cst_18 = arith.constant 9.99999974E-6 : f32
    %33 = vector.broadcast %cst_18 : f32 to vector<4x1xf32>
    %34 = arith.addf %32, %33 : vector<4x1xf32>
    %35 = math.rsqrt %34 : vector<4x1xf32>
    %36 = vector.broadcast %35 : vector<4x1xf32> to vector<4x256xf32>
    %37 = arith.mulf %27, %36 : vector<4x256xf32>
    %38 = vector.broadcast %15 : vector<4x1xf32> to vector<4x256xf32>
    %39 = arith.mulf %38, %37 : vector<4x256xf32>
    %40 = vector.broadcast %19 : vector<4x1xf32> to vector<4x256xf32>
    %41 = arith.addf %39, %40 : vector<4x256xf32>
    %c0_19 = arith.constant 0 : index
    %c0_20 = arith.constant 0 : index
    %c0_21 = arith.constant 0 : index
    %42 = vector.load %arg8[%c0_19, %c0_20, %c0_21] : memref<1x4x256xf32, #tpu.memory_space<vmem>>, vector<1x4x256xf32>
    %43 = vector.shape_cast %42 : vector<1x4x256xf32> to vector<4x256xf32>
    %44 = vector.shape_cast %41 : vector<4x256xf32> to vector<1x4x256xf32>
    tpu.vector_store %arg8[%c0_19, %c0_20, %c0_21], %44 {strides = array<i32>} : memref<1x4x256xf32, #tpu.memory_space<vmem>>, vector<1x4x256xf32>,
    return
  }
  func.func @transform_0(%arg0: i32, %arg1: i32) -> (i32, i32, i32) {
    %c0_i32 = arith.constant 0 : i32
    %c0_i32_0 = arith.constant 0 : i32
    return %arg0, %arg1, %c0_i32 : i32, i32, i32
  }
  func.func @transform_1(%arg0: i32, %arg1: i32) -> (i32, i32) {
    %c0_i32 = arith.constant 0 : i32
    %c0_i32_0 = arith.constant 0 : i32
    %c0_i32_1 = arith.constant 0 : i32
    return %c0_i32, %c0_i32_0 : i32, i32
  }
  func.func @transform_2(%arg0: i32, %arg1: i32) -> (i32, i32) {
    %c0_i32 = arith.constant 0 : i32
    %c0_i32_0 = arith.constant 0 : i32
    return %arg1, %c0_i32 : i32, i32
  }
  func.func @transform_3(%arg0: i32, %arg1: i32) -> (i32, i32) {
    %c0_i32 = arith.constant 0 : i32
    %c0_i32_0 = arith.constant 0 : i32
    return %arg1, %c0_i32 : i32, i32
  }
  func.func @transform_4(%arg0: i32, %arg1: i32) -> (i32, i32) {
    %c0_i32 = arith.constant 0 : i32
    %c0_i32_0 = arith.constant 0 : i32
    return %arg1, %c0_i32 : i32, i32
  }
  func.func @transform_5(%arg0: i32, %arg1: i32) -> (i32, i32) {
    %c0_i32 = arith.constant 0 : i32
    %c0_i32_0 = arith.constant 0 : i32
    return %arg1, %c0_i32 : i32, i32
  }
  func.func @transform_6(%arg0: i32, %arg1: i32) -> (i32, i32, i32) {
    %c0_i32 = arith.constant 0 : i32
    %c0_i32_0 = arith.constant 0 : i32
    return %arg0, %arg1, %c0_i32 : i32, i32, i32
  }
}

</mosaic_0001>

<bundles_post_ra>
// kernel: tpu_custom_call.1
= control target key start
LH: loop header
LB: loop body
LE: loop exit
PB: predicated region body
PF: predicated region fallthrough
CT: control target
= control target key end

     0   :  { %11 = vsyncpa [#allocation3], 0  ;;  %s1045_s0 = inlined_call_operand.hbm [shape: f32[2,4,256], index: 0, kind: input, shape index: {}]   ;;  %s1046_s1 = inlined_call_operand.vmem [shape: f32[2,32], index: 1, kind: input, shape index: {}]   ;;  %s1047_s2 = inlined_call_operand.vmem [shape: f32[4,32], index: 2, kind: input, shape index: {}]   ;;  %s1048_s3 = inlined_call_operand.vmem [shape: f32[4,1], index: 3, kind: input, shape index: {}]   ;;  %s1049_s4 = inlined_call_operand.vmem [shape: f32[4,32], index: 4, kind: input, shape index: {}]   ;;  %s1050_s5 = inlined_call_operand.vmem [shape: f32[4,1], index: 5, kind: input, shape index: {}]   ;;  %s1051_s6 = inlined_call_operand.hbm [shape: f32[2,4,256], index: 6, kind: output, shape index: {}]  }
   0x1   :  { %13 = vsyncpa [#allocation3 + $0x1], 0 }
   0x2   :  { %14 = vsyncpa [#allocation4], 0 }
   0x3   :  { %16 = vsyncpa [#allocation4 + $0x1], 0  ;;  %s849_s21 = smov 0   ;;  %s851_s22 = smov 0  }
   0x4   :  { %s853_s23 = smov 0   ;;  %s855_s24 = smov 0  }
   0x5   :  { %s857_s25 = smov 0   ;;  %s859_s26 = smov 0  }
   0x6 LB: > { %s605_s27 = sadd.s32 4294967295, %s808_s26   ;;  %s606_s28 = sadd.s32 4294967294, %s808_s26   ;;  %s808_s26 = sphi %s859_s26, %s22_s26   ;;  %s804_s25 = sphi %s857_s25, %s1067_s25   ;;  %s800_s24 = sphi %s855_s24, %s1066_s24   ;;  %s796_s23 = sphi %s853_s23, %s1065_s23   ;;  %s792_s22 = sphi %s851_s22, %s1064_s22   ;;  %s788_s21 = sphi %s849_s21, %s1063_s21  }
   0x7   : > { %s34_s29 = sadd.s32 1, %s804_s25  ;;  %s43_s30 = sadd.s32 1, %s796_s23 }
   0x8   : > { %p36_p0 = scmp.ge.s32.totalorder %s34_s29, 2  ;;  %p50_p1 = scmp.ne.s32.totalorder %s796_s23, %s792_s22 }
   0x9   : > { %p51_p2 = scmp.eq.s32.totalorder %s808_s26, 0  ;;  %p56_p3 = scmp.ne.s32.totalorder %s792_s22, %s788_s21 }
   0xa   : > { %s1069_s29 = smov (%p36_p0, %s34_s29), 0  ;;  %p57_p5 = scmp.eq.s32.totalorder %s605_s27, 0 }
   0xb   : > { %p890_p4 = por %p51_p2, %p50_p1  ;;  %s38_s8 = ssub.s32 %s804_s25, %s1069_s29 }
   0xc   : > { %p207_p6 = scmp.eq.s32.totalorder %s605_s27, 1  ;;  %p41_p7 = scmp.eq.s32.totalorder %s38_s8, 0 }
   0xd   : > { %p896_p8 = por %p57_p5, %p56_p3  ;;  %p213_p10 = scmp.eq.s32.totalorder %s606_s28, 1 }
   0xe   : > { %p900_p9 = por %p207_p6, %p50_p1  ;;  %p639_p13 = scmp.lt.s32.totalorder %s808_s26, 2 }
   0xf   : > { %s905_s11 = scalar_select %p41_p7, %s796_s23, %s43_s30  }
  0x10   : > { %s1055_s10 = scalar_select %p900_p9, 1, 0 }
  0x11   : > { %p907_p11 = por %p213_p10, %p56_p3  ;;  %s264_s13 = sand.u32 1, %s796_s23  }
  0x12   : > { %s613_s14 = sshll.u32 %s264_s13, 3  ;;  %s625_s15 = sshll.u32 %s804_s25, 7 }
  0x13   : > { %s1056_s12 = scalar_select %p907_p11, 1, 0 }
  0x14   : > { %s918_s18 = scalar_lea.hbm %s1045_s0, %s625_s15  ;;  %s268_s19 = scalar_lea.vmem [#allocation2], %s613_s14 }
  0x15   : > { %s278_s20 = sshll.u32 %s268_s19, 4  ;;  %p924_p0 = pnand %p639_p13, %p890_p4  ;;  %s920_s20 = int_to_ptr.vmem [resolvable:$true] %s278_s20 }
  0x16   : > { %s265_s28 = scalar_lea.sflag [#allocation3], %s264_s13  ;;  %s696_s30 = scalar_lea.hbm %s918_s18, 128 }
  0x17   : > { %p697_p3 = scmp.ne.s32.totalorder %s918_s18, %s696_s30  ;;  %p698_p5 = pneg %p924_p0 }
  0x18   : > { %s701_s7 = scalar_lea.hbm %s1045_s0, 256  ;;  %p702_p4 = scmp.lt.u32.totalorder %s918_s18, %s1045_s0 }
  0x19   : > { %p699_p6 = pnand %p698_p5, %p697_p3  ;;  %p703_p10 = scmp.lt.u32.totalorder %s701_s7, %s696_s30 }
  0x1a   : > { %p705_p12 = scmp.lt.u32.totalorder %s696_s30, %s918_s18 }
  0x1b   : > { %p700_p7 = pneg %p699_p6  ;;  %p704_p13 = por %p703_p10, %p702_p4 }
  0x1d   : > { %p706_p1 = por %p705_p12, %p704_p13 }
  0x1f   : > { %p707_p2 = pnand %p706_p1, %p700_p7 }
  0x21   : > { %710 = shalt.err (!%p707_p2)
}
  0x22   : > { %s711_s13 = scalar_lea.vmem %s920_s20, 128  ;;  %s810_s17 = smov [#allocation2]  }
  0x23   : > { %p712_p3 = scmp.ne.s32.totalorder %s920_s20, %s711_s13  ;;  %s716_s19 = sshll.u32 %s810_s17, 4  ;;  %s717_s19 = int_to_ptr.vmem [resolvable:$false] %s716_s19 }
  0x24   : > { %s718_s8 = scalar_lea.vmem %s717_s19, 256  ;;  %p719_p9 = scmp.lt.s32.totalorder %s920_s20, %s717_s19 }
  0x25   : > { %p714_p6 = pnand %p712_p3, %p698_p5  ;;  %p720_p4 = scmp.lt.s32.totalorder %s718_s8, %s711_s13 }
  0x27   : > { %p715_p11 = pneg %p714_p6  ;;  %p721_p10 = por %p720_p4, %p719_p9 }
  0x29   : > { %p722_p12 = pnand %p721_p10, %p715_p11 }
  0x2b   : > { %725 = shalt.err (!%p722_p12)
}
  0x2c   : > { %634 = dma.hbm_to_vmem [thread:$0]  (!%p924_p0), %s918_s18, 128, %s920_s20, %s265_s28  }
  0x2d   : > { %p1058_p1 = scmp.lt.s32.totalorder %s808_s26, 3  ;;  %p1059_p2 = scmp.ge.s32.totalorder %s808_s26, 1 }
  0x2f   : > { %p284_p5 = pnand %p1059_p2, %p1058_p1 }
  0x30   : > { %s960_s30 = sand.u32 (!%p284_p5), 1, %s792_s22  }
  0x31   : > { %287 = sbr.rel (%p284_p5) target bundleno = 401 (0x191), region = 44  ;;  %s617_s14 = sshll.u32 (!%p284_p5), %s960_s30, 3 }
  0x32   : > { %s290_s7 = scalar_lea.sflag (!%p284_p5), [#allocation3], %s960_s30  ;;  %s293_s27 = scalar_lea.vmem (!%p284_p5), [#allocation2], %s617_s14 }
  0x38   : > { %779 = dma.done.wait (%p896_p8), %s290_s7, 128  }
  0x39   : > { %781 = vsyncadd (%p896_p8), %s290_s7, 4294967168  ;;  %s354_s28 = scalar_lea.vmem %s1046_s1, %s800_s24  ;;  %vm381_vm0 = vcmask 1043456   ;;  %v377_v0 = vld [vmem:[%s293_s27] sm:$0xff]  ;;  %vm362_vm1 = vcmask 257024   ;;  %v811_v12 = vmov 0   ;;  %v393_v15 = vlaneseq  ;;  %s626_s27 = sshll.u32 %s800_s24, 7 }
  0x3a   : > { %v619_v1 = vld [vmem:[%s354_s28] ss:$0 sm:$0xff]  ;;  %v379_v3 = vcombine.high %v377_v0, %v377_v0  ;;  %v382_v4 = vsel %vm381_vm0, %v377_v0, 0.0  ;;  %691 = vset.pattern.permute.xlu0 %v811_v12  ;;  %692 = vset.pattern.permute.xlu1 %v811_v12  ;;  %v812_v13 = vmov 839922192   ;;  %s337_s18 = scalar_lea.vmem [#allocation5], %s617_s14  ;;  %s996_s16 = scalar_lea.hbm %s1051_s6, %s626_s27 }
  0x3b   : > { %v356_v2 = vld [vmem:[%s1047_s2] sm:$0xf]  ;;  %v391_v14 = vunpack.c.l.s4 %v812_v13  ;;  %v394_v17 = vshrl.u32 %v393_v15, 7  ;;  %s460_s20 = sshll.u32 %s337_s18, 4  ;;  %s444_s13 = scalar_lea.sflag [#allocation4], %s960_s30  ;;  %s998_s20 = int_to_ptr.vmem [resolvable:$true] %s460_s20 }
  0x3c   : > { %v366_v5 = vld [vmem:[%s1049_s4] sm:$0xf]  ;;  %v383_v7 = vsel %vm381_vm0, %v379_v3, 0.0  ;;  %v361_v8 = vmul.f32 %v619_v1, %v356_v2  ;;  %s726_s17 = scalar_lea.vmem %s998_s20, 128  ;;  %p1060_p9 = scmp.ne.s32.totalorder %s1055_s10, 0 }
  0x3d   : > { %v367_v6 = vmul.f32 %v619_v1, %v366_v5  ;;  %v384_v9 = vadd.f32 %v383_v7, %v382_v4  ;;  %v392_v16 = vunpack.c.0.s8 %v391_v14  ;;  %v372_v22 = vld [vmem:[%s1048_s3] sm:$0xf]  ;;  %p727_p8 = scmp.ne.s32.totalorder %s998_s20, %s726_s17  ;;  %s813_s24 = smov [#allocation5]  }
  0x3e   : > { %v363_v11 = vsel %vm362_vm1, %v361_v8, 0.0  ;;  %v375_v34 = vld [vmem:[%s1050_s5] sm:$0xf]  ;;  %s730_s14 = sshll.u32 %s813_s24, 4  ;;  %s731_s14 = int_to_ptr.vmem [resolvable:$false] %s730_s14 }
  0x3f   : > { %v368_v10 = vsel %vm362_vm1, %v367_v6, 0.0  ;;  %385 = vadd.xlane.f32.xlu0 %v384_v9  ;;  %v395_v18 = vsub.s32 %v392_v16, %v394_v17  ;;  %p728_p11 = pnand %p727_p8, %p1060_p9  ;;  %s732_s9 = scalar_lea.vmem %s731_s14, 256 }
  0x40   : > { %369 = vadd.xlane.f32.xlu1 %v368_v10  ;;  %p733_p7 = scmp.lt.s32.totalorder %s998_s20, %s731_s14  ;;  %p734_p13 = scmp.lt.s32.totalorder %s732_s9, %s726_s17 }
  0x41   : > { %p729_p0 = pneg %p728_p11 }
  0x42   : > { %p735_p3 = por %p734_p13, %p733_p7 }
  0x43   : > { %364 = vadd.xlane.f32.xlu0 %v363_v11 }
  0x44   : > { %p736_p6 = pnand %p735_p3, %p729_p0 }
  0xcc   : > { %v386_v19 = vpop.xlane.xlu0 %385 }
  0xcd   : > { %v388_v20 = vmul.f32 0.00390625, %v386_v19  ;;  %v370_v32 = vpop.xlane.xlu1 %369 }
  0xce   : > { %v374_v33 = vmul.f32 0.25, %v370_v32 }
  0xcf   : > { %v396_v21 = vrot.slane %v388_v20, %v395_v18 }
  0xd0   : > { %v365_v23 = vpop.xlane.xlu0 %364  ;;  %v376_v35 = vadd.f32 %v375_v34, %v374_v33 }
  0xd1   : > { %v398_v24 = vsub.f32 %v377_v0, %v396_v21  ;;  %v371_v25 = vmul.f32 0.25, %v365_v23 }
  0xd3   : > { %v399_v26 = vmul.f32 %v398_v24, %v398_v24  ;;  %v373_v27 = vadd.f32 %v372_v22, %v371_v25 }
  0xd5   : > { %v401_v28 = vcombine.high %v399_v26, %v399_v26  ;;  %423 = vperm.xlu0 %691, %v373_v27   ;;  %v403_v29 = vsel %vm381_vm0, %v399_v26, 0.0 }
  0xd7   : > { %v404_v30 = vsel %vm381_vm0, %v401_v28, 0.0 }
  0xd8   : > { %v405_v31 = vadd.f32 %v404_v30, %v403_v29 }
  0xda   : > { %406 = vadd.xlane.f32.xlu1 %v405_v31 }
  0xeb   : > { %433 = vperm.xlu1 %692, %v376_v35  }
 0x154   : > { %v424_v41 = vpop.permute.xlu0 %423 }
 0x167   : > { %v407_v36 = vpop.xlane.xlu1 %406 }
 0x168   : > { %v408_v37 = vmul.f32 0.00390625, %v407_v36 }
 0x16a   : > { %v409_v38 = vadd.f32 1e-05, %v408_v37 }
 0x16b   : > { %v434_v45 = vpop.permute.xlu1 %433 }
 0x16c   : > { %694 = vrsqrt.f32 %v409_v38 }
 0x176   : > { %v695_v39 = vpop.eup %694 }
 0x177   : > { %v418_v40 = vrot.slane %v695_v39, %v395_v18 }
 0x179   : > { %v420_v42 = vmul.f32 %v418_v40, %v398_v24 }
 0x17b   : > { %v427_v43 = vcombine.high %v420_v42, %v420_v42  ;;  %v429_v44 = vmul.f32 %v424_v41, %v420_v42 }
 0x17d   : > { %v430_v46 = vmul.f32 %v427_v43, %v424_v41  ;;  %v436_v47 = vadd.f32 %v434_v45, %v429_v44 }
 0x17f   : > { %v437_v48 = vadd.f32 %v434_v45, %v430_v46 }
 0x181   : > { %v440_v49 = vcombine.low %v436_v47, %v437_v48 }
 0x183   : > { %442 = vst [vmem:[%s337_s18] sm:$0xff] %v440_v49 }
 0x184   : > { %739 = shalt.err (!%p736_p6)
}
 0x185   : > { %s740_s30 = scalar_lea.hbm %s996_s16, 128  ;;  %s744_s7 = scalar_lea.hbm %s1051_s6, 256 }
 0x186   : > { %p741_p4 = scmp.ne.s32.totalorder %s996_s16, %s740_s30  ;;  %p745_p1 = scmp.lt.u32.totalorder %s996_s16, %s1051_s6 }
 0x187   : > { %p746_p2 = scmp.lt.u32.totalorder %s744_s7, %s740_s30  ;;  %p748_p8 = scmp.lt.u32.totalorder %s740_s30, %s996_s16 }
 0x188   : > { %p742_p10 = pnand %p741_p4, %p1060_p9 }
 0x189   : > { %p747_p5 = por %p746_p2, %p745_p1 }
 0x18a   : > { %p743_p12 = pneg %p742_p10 }
 0x18b   : > { %p749_p11 = por %p748_p8, %p747_p5 }
 0x18d   : > { %p750_p0 = pnand %p749_p11, %p743_p12 }
 0x18f   : > { %753 = shalt.err (!%p750_p0)
}
 0x190   : > { %629 = dma.vmem_to_hbm [thread:$0]  (%p1060_p9), %s998_s20, 128, %s996_s16, %s444_s13  }
 0x191 PF: > { %s472_s28 = sand.u32 1, %s788_s21   ;;  %p1061_p7 = scmp.ne.s32.totalorder %s1056_s12, 0 }
 0x192   : > { %p1062_p13 = scmp.ge.s32.totalorder %s808_s26, 2  ;;  %s473_s15 = scalar_lea.sflag [#allocation4], %s472_s28 }
 0x194   : > { %p636_p3 = pnand %p1062_p13, %p1061_p7 }
 0x196   : > { %783 = dma.done.wait (!%p636_p3), %s473_s15, 128  }
 0x197   : > { %785 = vsyncadd (!%p636_p3), %s473_s15, 4294967168  ;;  %s22_s26 = sadd.s32 1, %s808_s26   ;;  %s1063_s21 = smov %s792_s22 }
 0x198   : > { %p19_p6 = scmp.ge.s32.totalorder %s22_s26, 4   ;;  %s1064_s22 = smov %s796_s23 }
 0x199   : > { %s1065_s23 = smov %s905_s11  ;;  %s1066_s24 = smov %s804_s25 }
 0x19a   : > { %s1067_s25 = smov %s1069_s29  ;;  %21 = sbr.rel (!%p19_p6) target bundleno = 6 (0x6), region = 102 }
 0x1a1   :  { %478 = vsyncpa [#allocation3], 1 }
 0x1a2   :  { %480 = vsyncpa [#allocation3 + $0x1], 1 }
 0x1a3   :  { %481 = vsyncpa [#allocation4], 1 }
 0x1a4   :  { %483 = vsyncpa [#allocation4 + $0x1], 1 }

</bundles_post_ra>
